<compile_context>
chip_gen: v7x
topology: tpu7x:2x2x1
jax: 0.10.0
libtpu: 0.0.40
codegen_flags: <defaults>
</compile_context>

<pallas_src>
import jax
import jax.numpy as jnp
from jax import lax
from jax.experimental import pallas as pl
from jax.experimental.pallas import tpu as pltpu


def _round_up(v, m):
    return (v + m - 1) // m * m


# ---------------------------------------------------------------------------
# Affine kernel: new_vertices = A @ x + b, points on the lane axis.
# ---------------------------------------------------------------------------
def _affine_kernel(p_ref, o_ref):
    # p_ref: (1, 16, TN) packed features with points on lanes.
    #   rows 4*i+j (j<3) = A[i, j], row 4*i+3 = b[i], rows 12..14 = x, row 15 pad.
    # o_ref: (1, 3, TN) new vertex coordinates.
    tn = p_ref.shape[2]
    chunk = tn
    for cand in (512, 256, 128):          # largest chunk that divides TN
        if tn % cand == 0:
            chunk = cand
            break
    for c in range(tn // chunk):          # static unroll over lane chunks
        s = slice(c * chunk, (c + 1) * chunk)
        x0 = p_ref[0, 12:13, s]
        x1 = p_ref[0, 13:14, s]
        x2 = p_ref[0, 14:15, s]
        for i in range(3):                # static unroll over output rows
            r = (p_ref[0, 4 * i + 0:4 * i + 1, s] * x0
                 + p_ref[0, 4 * i + 1:4 * i + 2, s] * x1
                 + p_ref[0, 4 * i + 2:4 * i + 3, s] * x2
                 + p_ref[0, 4 * i + 3:4 * i + 4, s])
            o_ref[0, i:i + 1, s] = r


# ---------------------------------------------------------------------------
# Stiffness kernel: (w[e0] - w[e1])**2 via blocked one-hot-difference matmul.
# ---------------------------------------------------------------------------
def _stiffness_kernel(e_ref, p_ref, o_ref, acc_ref):
    # e_ref: (2, TE) int32 edge endpoints (row 0 = e0, row 1 = e1).
    # p_ref: (1, 16, TN_W) packed weights (rows 0..11 = affine weight).
    # o_ref: (1, 12, TE) squared differences.
    # acc_ref: (16, TE) f32 accumulator over point blocks.
    k = pl.program_id(2)

    @pl.when(k == 0)
    def _():
        acc_ref[...] = jnp.zeros_like(acc_ref)

    tn_w = p_ref.shape[2]
    te = e_ref.shape[1]
    w = p_ref[0]                                            # (16, TN_W)
    off = k * tn_w                                          # scalar
    e0 = e_ref[0:1, :] - off                                # (1, TE), offset on the
    e1 = e_ref[1:2, :] - off                                # small operand, not the iota
    row = lax.broadcasted_iota(jnp.int32, (tn_w, te), 0)
    sel = ((row == e0).astype(jnp.float32)
           - (row == e1).astype(jnp.float32))               # +1 @ e0, -1 @ e1, else 0
    acc_ref[...] += jnp.dot(w, sel, preferred_element_type=jnp.float32)

    @pl.when(k == pl.num_programs(2) - 1)
    def _():
        d = acc_ref[...]
        o_ref[0] = (d * d)[:12, :].astype(o_ref.dtype)      # lane-dense 12-row slab


def local_affine_forward(A, b, x, edges):
    """A: (B,N,3,3), b: (B,N,3,1), x: (B,N,3), edges: (E,2) int."""
    B, N, _, _ = A.shape
    E = edges.shape[0]
    dtype = x.dtype

    # ---- affine lane tile: as large as possible (mem-bound) ----
    if N <= 8192:
        N_pad = _round_up(N, 128)
        TN = N_pad                                   # whole row in one grid step
    else:
        TN = 4096
        N_pad = _round_up(N, TN)

    # ---- stiffness tiles ----
    TE = min(_round_up(E, 128), 512)                 # >=128 lanes: unmasked stores
    E_pad = _round_up(E, TE)
    # sel construction peak ~4 f32 copies of (TN_W, TE); keep it under ~6 MiB so
    # the kernel also fits v5e's 16 MiB scoped-VMEM default (and v7x's 64 MiB).
    sel_budget_bytes = 6 << 20
    tnw_cap = max(128, (sel_budget_bytes // (16 * TE)) // 128 * 128)
    if N_pad <= tnw_cap:
        TN_W = N_pad                                 # weight slab resident per batch
    else:
        TN_W = 128
        for cand in range(tnw_cap, 127, -128):       # largest divisor of N_pad
            if N_pad % cand == 0:
                TN_W = cand
                break
    n_k = N_pad // TN_W

    # ---- single packed, lane-dense feature tensor shared by both kernels ----
    w12 = jnp.concatenate([A, b], axis=3).reshape(B, N, 12)       # (3,4) row-major
    feat = jnp.concatenate(
        [w12, x, jnp.zeros((B, N, 1), dtype)], axis=2)            # (B, N, 16)
    if N_pad != N:
        feat = jnp.pad(feat, ((0, 0), (0, N_pad - N), (0, 0)))
    packed = jnp.transpose(feat, (0, 2, 1))                       # (B, 16, N_pad)

    # ---- new_vertices = A @ x + b (VPU, points on lanes) ----
    yT = pl.pallas_call(
        _affine_kernel,
        out_shape=jax.ShapeDtypeStruct((B, 3, N_pad), dtype),
        grid=(B, N_pad // TN),
        in_specs=[pl.BlockSpec((1, 16, TN), lambda bi, ni: (bi, 0, ni))],
        out_specs=pl.BlockSpec((1, 3, TN), lambda bi, ni: (bi, 0, ni)),
        compiler_params=pltpu.CompilerParams(
            dimension_semantics=("parallel", "parallel")),
    )(packed)
    new_vertices = jnp.transpose(yT[:, :, :N], (0, 2, 1))          # (B, N, 3)

    # ---- stiffness via blocked one-hot-difference matmul ----
    e2 = edges.astype(jnp.int32).T                                 # (2, E)
    if E_pad != E:
        e2 = jnp.pad(e2, ((0, 0), (0, E_pad - E)))                 # pad edges -> (0,0): zero diff

    # When n_k == 1 the weight index_map is constant across consecutive edge
    # blocks, so Pallas DMAs the slab once per batch (VMEM-resident).
    stiff_lane = pl.pallas_call(
        _stiffness_kernel,
        out_shape=jax.ShapeDtypeStruct((B, 12, E_pad), dtype),
        grid_spec=pltpu.PrefetchScalarGridSpec(
            num_scalar_prefetch=0,
            grid=(B, E_pad // TE, n_k),
            in_specs=[
                pl.BlockSpec((2, TE), lambda bi, j, k: (0, j)),
                pl.BlockSpec((1, 16, TN_W), lambda bi, j, k: (bi, 0, k)),
            ],
            out_specs=pl.BlockSpec((1, 12, TE), lambda bi, j, k: (bi, 0, j)),
            scratch_shapes=[pltpu.VMEM((16, TE), jnp.float32)],
        ),
        compiler_params=pltpu.CompilerParams(
            dimension_semantics=("parallel", "parallel", "arbitrary")),
    )(e2, packed)
    stiffness = jnp.transpose(
        stiff_lane[:, :, :E], (0, 2, 1)).reshape(B, E, 3, 4)
    return new_vertices, stiffness


def _reference(A, b, x, edges):
    # Pure-VPU reference (avoids XLA's default-precision bf16 matmul path).
    new_v = jnp.sum(A * x[:, :, None, :], axis=-1) + b[..., 0]
    w = jnp.concatenate([A, b], axis=3)
    w1 = jnp.take(w, edges[:, 0], axis=1)
    w2 = jnp.take(w, edges[:, 1], axis=1)
    return new_v, (w1 - w2) ** 2


if __name__ == "__main__":
    B, N, E = 2, 256, 64
    key = jax.random.PRNGKey(0)
    k1, k2, k3, k4 = jax.random.split(key, 4)

    # Parameters: __init__ uses identity / zeros; add a small deterministic
    # perturbation so the kernel math is actually exercised.
    A = (jnp.broadcast_to(jnp.eye(3, dtype=jnp.float32), (B, N, 3, 3))
         + 0.05 * jax.random.normal(k2, (B, N, 3, 3), dtype=jnp.float32))
    b = 0.05 * jax.random.normal(k3, (B, N, 3, 1), dtype=jnp.float32)

    x = jax.random.normal(k1, (B, N, 3), dtype=jnp.float32)
    edges = jax.random.randint(k4, (E, 2), 0, N, dtype=jnp.int32)

    new_v, stiff = local_affine_forward(A, b, x, edges)
    jax.block_until_ready((new_v, stiff))

    ref_v, ref_s = _reference(A, b, x, edges)
    assert new_v.shape == (B, N, 3) and stiff.shape == (B, E, 3, 4)
    assert jnp.allclose(new_v, ref_v, atol=1e-5, rtol=1e-5)
    assert jnp.allclose(stiff, ref_s, atol=1e-4, rtol=1e-4)

    print("KERNEL_OK")
</pallas_src>

<mosaic_0001>
module attributes {stable_mosaic.version = 11 : i64} {
  func.func @_affine_kernel(%arg0: i32, %arg1: i32, %arg2: memref<1x16x256xf32, #tpu.memory_space<vmem>>, %arg3: memref<1x3x256xf32, #tpu.memory_space<vmem>>) attributes {dimension_semantics = [#tpu.dimension_semantics<parallel>, #tpu.dimension_semantics<parallel>], iteration_bounds = array<i64: 2, 1>, scalar_prefetch = 0 : i64, scratch_operands = 0 : i64, tpu.core_type = #tpu.core_type<tc>, window_params = [{transform_indices = @transform_0, window_bounds = array<i64: 1, 16, 256>}, {transform_indices = @transform_1, window_bounds = array<i64: 1, 3, 256>}]} {
    %c0 = arith.constant 0 : index
    %c12 = arith.constant 12 : index
    %c0_0 = arith.constant 0 : index
    %0 = vector.load %arg2[%c0, %c12, %c0_0] : memref<1x16x256xf32, #tpu.memory_space<vmem>>, vector<1x1x256xf32>
    %1 = vector.shape_cast %0 : vector<1x1x256xf32> to vector<1x256xf32>
    %c0_1 = arith.constant 0 : index
    %c13 = arith.constant 13 : index
    %c0_2 = arith.constant 0 : index
    %2 = vector.load %arg2[%c0_1, %c13, %c0_2] : memref<1x16x256xf32, #tpu.memory_space<vmem>>, vector<1x1x256xf32>
    %3 = vector.shape_cast %2 : vector<1x1x256xf32> to vector<1x256xf32>
    %c0_3 = arith.constant 0 : index
    %c14 = arith.constant 14 : index
    %c0_4 = arith.constant 0 : index
    %4 = vector.load %arg2[%c0_3, %c14, %c0_4] : memref<1x16x256xf32, #tpu.memory_space<vmem>>, vector<1x1x256xf32>
    %5 = vector.shape_cast %4 : vector<1x1x256xf32> to vector<1x256xf32>
    %c0_5 = arith.constant 0 : index
    %c0_6 = arith.constant 0 : index
    %c0_7 = arith.constant 0 : index
    %6 = vector.load %arg2[%c0_5, %c0_6, %c0_7] : memref<1x16x256xf32, #tpu.memory_space<vmem>>, vector<1x1x256xf32>
    %7 = vector.shape_cast %6 : vector<1x1x256xf32> to vector<1x256xf32>
    %8 = arith.mulf %7, %1 : vector<1x256xf32>
    %c0_8 = arith.constant 0 : index
    %c1 = arith.constant 1 : index
    %c0_9 = arith.constant 0 : index
    %9 = vector.load %arg2[%c0_8, %c1, %c0_9] : memref<1x16x256xf32, #tpu.memory_space<vmem>>, vector<1x1x256xf32>
    %10 = vector.shape_cast %9 : vector<1x1x256xf32> to vector<1x256xf32>
    %11 = arith.mulf %10, %3 : vector<1x256xf32>
    %12 = arith.addf %8, %11 : vector<1x256xf32>
    %c0_10 = arith.constant 0 : index
    %c2 = arith.constant 2 : index
    %c0_11 = arith.constant 0 : index
    %13 = vector.load %arg2[%c0_10, %c2, %c0_11] : memref<1x16x256xf32, #tpu.memory_space<vmem>>, vector<1x1x256xf32>
    %14 = vector.shape_cast %13 : vector<1x1x256xf32> to vector<1x256xf32>
    %15 = arith.mulf %14, %5 : vector<1x256xf32>
    %16 = arith.addf %12, %15 : vector<1x256xf32>
    %c0_12 = arith.constant 0 : index
    %c3 = arith.constant 3 : index
    %c0_13 = arith.constant 0 : index
    %17 = vector.load %arg2[%c0_12, %c3, %c0_13] : memref<1x16x256xf32, #tpu.memory_space<vmem>>, vector<1x1x256xf32>
    %18 = vector.shape_cast %17 : vector<1x1x256xf32> to vector<1x256xf32>
    %19 = arith.addf %16, %18 : vector<1x256xf32>
    %c0_14 = arith.constant 0 : index
    %c0_15 = arith.constant 0 : index
    %c0_16 = arith.constant 0 : index
    %20 = vector.load %arg3[%c0_14, %c0_15, %c0_16] : memref<1x3x256xf32, #tpu.memory_space<vmem>>, vector<1x1x256xf32>
    %21 = vector.shape_cast %20 : vector<1x1x256xf32> to vector<1x256xf32>
    %22 = vector.shape_cast %19 : vector<1x256xf32> to vector<1x1x256xf32>
    tpu.vector_store %arg3[%c0_14, %c0_15, %c0_16], %22 {strides = array<i32>} : memref<1x3x256xf32, #tpu.memory_space<vmem>>, vector<1x1x256xf32>,
    %c0_17 = arith.constant 0 : index
    %c4 = arith.constant 4 : index
    %c0_18 = arith.constant 0 : index
    %23 = vector.load %arg2[%c0_17, %c4, %c0_18] : memref<1x16x256xf32, #tpu.memory_space<vmem>>, vector<1x1x256xf32>
    %24 = vector.shape_cast %23 : vector<1x1x256xf32> to vector<1x256xf32>
    %25 = arith.mulf %24, %1 : vector<1x256xf32>
    %c0_19 = arith.constant 0 : index
    %c5 = arith.constant 5 : index
    %c0_20 = arith.constant 0 : index
    %26 = vector.load %arg2[%c0_19, %c5, %c0_20] : memref<1x16x256xf32, #tpu.memory_space<vmem>>, vector<1x1x256xf32>
    %27 = vector.shape_cast %26 : vector<1x1x256xf32> to vector<1x256xf32>
    %28 = arith.mulf %27, %3 : vector<1x256xf32>
    %29 = arith.addf %25, %28 : vector<1x256xf32>
    %c0_21 = arith.constant 0 : index
    %c6 = arith.constant 6 : index
    %c0_22 = arith.constant 0 : index
    %30 = vector.load %arg2[%c0_21, %c6, %c0_22] : memref<1x16x256xf32, #tpu.memory_space<vmem>>, vector<1x1x256xf32>
    %31 = vector.shape_cast %30 : vector<1x1x256xf32> to vector<1x256xf32>
    %32 = arith.mulf %31, %5 : vector<1x256xf32>
    %33 = arith.addf %29, %32 : vector<1x256xf32>
    %c0_23 = arith.constant 0 : index
    %c7 = arith.constant 7 : index
    %c0_24 = arith.constant 0 : index
    %34 = vector.load %arg2[%c0_23, %c7, %c0_24] : memref<1x16x256xf32, #tpu.memory_space<vmem>>, vector<1x1x256xf32>
    %35 = vector.shape_cast %34 : vector<1x1x256xf32> to vector<1x256xf32>
    %36 = arith.addf %33, %35 : vector<1x256xf32>
    %c0_25 = arith.constant 0 : index
    %c1_26 = arith.constant 1 : index
    %c0_27 = arith.constant 0 : index
    %37 = vector.load %arg3[%c0_25, %c1_26, %c0_27] : memref<1x3x256xf32, #tpu.memory_space<vmem>>, vector<1x1x256xf32>
    %38 = vector.shape_cast %37 : vector<1x1x256xf32> to vector<1x256xf32>
    %39 = vector.shape_cast %36 : vector<1x256xf32> to vector<1x1x256xf32>
    tpu.vector_store %arg3[%c0_25, %c1_26, %c0_27], %39 {strides = array<i32>} : memref<1x3x256xf32, #tpu.memory_space<vmem>>, vector<1x1x256xf32>,
    %c0_28 = arith.constant 0 : index
    %c8 = arith.constant 8 : index
    %c0_29 = arith.constant 0 : index
    %40 = vector.load %arg2[%c0_28, %c8, %c0_29] : memref<1x16x256xf32, #tpu.memory_space<vmem>>, vector<1x1x256xf32>
    %41 = vector.shape_cast %40 : vector<1x1x256xf32> to vector<1x256xf32>
    %42 = arith.mulf %41, %1 : vector<1x256xf32>
    %c0_30 = arith.constant 0 : index
    %c9 = arith.constant 9 : index
    %c0_31 = arith.constant 0 : index
    %43 = vector.load %arg2[%c0_30, %c9, %c0_31] : memref<1x16x256xf32, #tpu.memory_space<vmem>>, vector<1x1x256xf32>
    %44 = vector.shape_cast %43 : vector<1x1x256xf32> to vector<1x256xf32>
    %45 = arith.mulf %44, %3 : vector<1x256xf32>
    %46 = arith.addf %42, %45 : vector<1x256xf32>
    %c0_32 = arith.constant 0 : index
    %c10 = arith.constant 10 : index
    %c0_33 = arith.constant 0 : index
    %47 = vector.load %arg2[%c0_32, %c10, %c0_33] : memref<1x16x256xf32, #tpu.memory_space<vmem>>, vector<1x1x256xf32>
    %48 = vector.shape_cast %47 : vector<1x1x256xf32> to vector<1x256xf32>
    %49 = arith.mulf %48, %5 : vector<1x256xf32>
    %50 = arith.addf %46, %49 : vector<1x256xf32>
    %c0_34 = arith.constant 0 : index
    %c11 = arith.constant 11 : index
    %c0_35 = arith.constant 0 : index
    %51 = vector.load %arg2[%c0_34, %c11, %c0_35] : memref<1x16x256xf32, #tpu.memory_space<vmem>>, vector<1x1x256xf32>
    %52 = vector.shape_cast %51 : vector<1x1x256xf32> to vector<1x256xf32>
    %53 = arith.addf %50, %52 : vector<1x256xf32>
    %c0_36 = arith.constant 0 : index
    %c2_37 = arith.constant 2 : index
    %c0_38 = arith.constant 0 : index
    %54 = vector.load %arg3[%c0_36, %c2_37, %c0_38] : memref<1x3x256xf32, #tpu.memory_space<vmem>>, vector<1x1x256xf32>
    %55 = vector.shape_cast %54 : vector<1x1x256xf32> to vector<1x256xf32>
    %56 = vector.shape_cast %53 : vector<1x256xf32> to vector<1x1x256xf32>
    tpu.vector_store %arg3[%c0_36, %c2_37, %c0_38], %56 {strides = array<i32>} : memref<1x3x256xf32, #tpu.memory_space<vmem>>, vector<1x1x256xf32>,
    return
  }
  func.func @transform_0(%arg0: i32, %arg1: i32) -> (i32, i32, i32) {
    %c0_i32 = arith.constant 0 : i32
    %c0_i32_0 = arith.constant 0 : i32
    return %arg0, %c0_i32, %arg1 : i32, i32, i32
  }
  func.func @transform_1(%arg0: i32, %arg1: i32) -> (i32, i32, i32) {
    %c0_i32 = arith.constant 0 : i32
    %c0_i32_0 = arith.constant 0 : i32
    return %arg0, %c0_i32, %arg1 : i32, i32, i32
  }
}

</mosaic_0001>

<bundles_post_ra>
// kernel: tpu_custom_call.1
= control target key start
LH: loop header
LB: loop body
LE: loop exit
PB: predicated region body
PF: predicated region fallthrough
CT: control target
= control target key end

     0   :  { %6 = vsyncpa [#allocation3], 0  ;;  %s643_s0 = inlined_call_operand.hbm [shape: f32[2,16,256], index: 0, kind: input, shape index: {}]   ;;  %s644_s1 = inlined_call_operand.vmem [shape: f32[2,3,256], index: 1, kind: output, shape index: {}]  }
   0x1   :  { %8 = vsyncpa [#allocation3 + $0x1], 0  ;;  %s499_s6 = smov 0   ;;  %s501_s7 = smov 0  }
   0x2   :  { %s503_s8 = smov 0   ;;  %s505_s9 = smov 0  }
   0x3   :  { %s507_s10 = smov 0   ;;  %s509_s11 = smov 0  }
   0x4 LB: > { %s316_s12 = sadd.s32 4294967295, %s484_s11   ;;  %s26_s13 = sadd.s32 1, %s480_s10  ;;  %s484_s11 = sphi %s509_s11, %s14_s11   ;;  %s480_s10 = sphi %s507_s10, %s652_s10   ;;  %s476_s9 = sphi %s505_s9, %s651_s9   ;;  %s472_s8 = sphi %s503_s8, %s650_s8   ;;  %s468_s7 = sphi %s501_s7, %s649_s7   ;;  %s464_s6 = sphi %s499_s6, %s648_s6  }
   0x5   : > { %p28_p0 = scmp.ge.s32.totalorder %s26_s13, 2  ;;  %s35_s14 = sadd.s32 1, %s472_s8 }
   0x6   : > { %p42_p1 = scmp.ne.s32.totalorder %s472_s8, %s468_s7  ;;  %p43_p2 = scmp.eq.s32.totalorder %s484_s11, 0 }
   0x7   : > { %s654_s13 = smov (%p28_p0, %s26_s13), 0  ;;  %p48_p4 = scmp.ne.s32.totalorder %s468_s7, %s464_s6 }
   0x8   : > { %p535_p3 = por %p43_p2, %p42_p1  ;;  %s30_s16 = ssub.s32 %s480_s10, %s654_s13 }
   0x9   : > { %p49_p5 = scmp.eq.s32.totalorder %s316_s12, 0  ;;  %p33_p6 = scmp.eq.s32.totalorder %s30_s16, 0 }
   0xa   : > { %p353_p8 = scmp.lt.s32.totalorder %s484_s11, 2  ;;  %s100_s19 = sand.u32 1, %s472_s8  }
   0xb   : > { %p542_p7 = por %p49_p5, %p48_p4  ;;  %s345_s20 = sshll.u32 %s480_s10, 9 }
   0xc   : > { %s548_s18 = scalar_select %p33_p6, %s472_s8, %s35_s14  }
   0xd   : > { %s320_s21 = sshll.u32 %s100_s19, 5  ;;  %s555_s24 = scalar_lea.hbm %s643_s0, %s345_s20 }
   0xe   : > { %s104_s25 = scalar_lea.vmem [#allocation2], %s320_s21  ;;  %p559_p9 = pnand %p353_p8, %p535_p3 }
   0xf   : > { %s113_s26 = sshll.u32 %s104_s25, 4  ;;  %s565_s28 = scalar_lea.sflag [#allocation3], %s100_s19  ;;  %s563_s26 = int_to_ptr.vmem [resolvable:$true] %s113_s26 }
  0x10   : > { %s404_s29 = scalar_lea.hbm %s555_s24, 512  ;;  %p406_p11 = pneg %p559_p9 }
  0x11   : > { %p405_p10 = scmp.ne.s32.totalorder %s555_s24, %s404_s29  ;;  %s409_s3 = scalar_lea.hbm %s643_s0, 1024 }
  0x12   : > { %p410_p0 = scmp.lt.u32.totalorder %s555_s24, %s643_s0  ;;  %p411_p1 = scmp.lt.u32.totalorder %s409_s3, %s404_s29 }
  0x13   : > { %p407_p12 = pnand %p406_p11, %p405_p10  ;;  %p413_p3 = scmp.lt.u32.totalorder %s404_s29, %s555_s24 }
  0x14   : > { %p412_p2 = por %p411_p1, %p410_p0 }
  0x15   : > { %p408_p13 = pneg %p407_p12 }
  0x16   : > { %p414_p4 = por %p413_p3, %p412_p2 }
  0x18   : > { %p415_p5 = pnand %p414_p4, %p408_p13 }
  0x1a   : > { %418 = shalt.err (!%p415_p5)
}
  0x1b   : > { %s419_s6 = scalar_lea.vmem %s563_s26, 512  ;;  %s486_s12 = smov [#allocation2]  }
  0x1c   : > { %p420_p6 = scmp.ne.s32.totalorder %s563_s26, %s419_s6  ;;  %s424_s14 = sshll.u32 %s486_s12, 4  ;;  %s425_s14 = int_to_ptr.vmem [resolvable:$false] %s424_s14 }
  0x1d   : > { %s426_s15 = scalar_lea.vmem %s425_s14, 1024  ;;  %p427_p12 = scmp.lt.s32.totalorder %s563_s26, %s425_s14 }
  0x1e   : > { %p422_p8 = pnand %p420_p6, %p406_p11  ;;  %p428_p0 = scmp.lt.s32.totalorder %s426_s15, %s419_s6 }
  0x20   : > { %p423_p10 = pneg %p422_p8  ;;  %p429_p1 = por %p428_p0, %p427_p12 }
  0x22   : > { %p430_p2 = pnand %p429_p1, %p423_p10 }
  0x24   : > { %433 = shalt.err (!%p430_p2)
}
  0x25   : > { %s487_s16 = smov 256   ;;  %s488_s19 = smov 16  }
  0x26   : > { %352 = dma.hbm_to_vmem [thread:$0]  (!%p559_p9), %s555_s24, 512, %s563_s26, %s565_s28, %s487_s16, %s487_s16, %s488_s19  }
  0x27   : > { %p323_p11 = scmp.ge.s32.totalorder %s484_s11, 1  ;;  %p121_p13 = scmp.lt.s32.totalorder %s484_s11, 3 }
  0x29   : > { %p122_p3 = pnand %p323_p11, %p121_p13 }
  0x2a   : > { %s127_s20 = sand.u32 (!%p122_p3), 1, %s468_s7  }
  0x2b   : > { %125 = sbr.rel (%p122_p3) target bundleno = 68 (0x44), region = 24  ;;  %s324_s21 = sshll.u32 (!%p122_p3), %s127_s20, 5 }
  0x2c   : > { %s128_s22 = scalar_lea.sflag (!%p122_p3), [#allocation3], %s127_s20  ;;  %s596_s23 = scalar_lea.vmem (!%p122_p3), [#allocation2], %s324_s21 }
  0x32   : > { %459 = dma.done.wait (%p542_p7), %s128_s22, 512  }
  0x33   : > { %461 = vsyncadd (%p542_p7), %s128_s22, 4294966784  ;;  %p156_p9 = scmp.lt.s32.totalorder %s476_s9, 1  ;;  %v327_v0 = vld [vmem:[%s596_s23 + $0x14] ss:$8 sm:$0x3]  ;;  %v184_v10 = vlaneseq }
  0x34   : > { %v328_v1 = vld [vmem:[%s596_s23 + $0x15] ss:$8 sm:$0x3]  ;;  %v329_v2 = vld [vmem:[%s596_s23 + $0x16] ss:$8 sm:$0x3] }
  0x35   : > { %s656_s9 = smov (!%p156_p9, %s476_s9), 1  ;;  %v171_v3 = vld [vmem:[%s596_s23] ss:$8 sm:$0x3]  ;;  %vm186_vm0 = vcmp.lt.s32.totalorder %v184_v10, 256 }
  0x36   : > { %v172_v4 = vmul.f32 %v327_v0, %v171_v3  ;;  %v330_v5 = vld [vmem:[%s596_s23 + $0x1] ss:$8 sm:$0x3]  ;;  %v331_v6 = vld [vmem:[%s596_s23 + $0x2] ss:$8 sm:$0x3] }
  0x37   : > { %s346_s17 = sshll.u32 %s656_s9, 3  ;;  %v175_v7 = vmul.f32 %v330_v5, %v328_v1  ;;  %v179_v8 = vmul.f32 %v331_v6, %v329_v2  ;;  %v333_v9 = vld [vmem:[%s596_s23 + $0x4] ss:$8 sm:$0x3] }
  0x38   : > { %v191_v11 = vmul.f32 %v333_v9, %v327_v0  ;;  %v334_v12 = vld [vmem:[%s596_s23 + $0x5] ss:$8 sm:$0x3]  ;;  %v335_v13 = vld [vmem:[%s596_s23 + $0x6] ss:$8 sm:$0x3]  ;;  %s163_s25 = scalar_lea.vmem %s644_s1, %s346_s17 }
  0x39   : > { %v176_v14 = vadd.f32 %v175_v7, %v172_v4  ;;  %v332_v15 = vld [vmem:[%s596_s23 + $0x3] ss:$8 sm:$0x3]  ;;  %v194_v16 = vmul.f32 %v334_v12, %v328_v1  ;;  %v198_v17 = vmul.f32 %v335_v13, %v329_v2  ;;  %v338_v18 = vld [vmem:[%s596_s23 + $0x10] ss:$8 sm:$0x3] }
  0x3a   : > { %v207_v19 = vmul.f32 %v338_v18, %v327_v0  ;;  %v339_v20 = vld [vmem:[%s596_s23 + $0x11] ss:$8 sm:$0x3]  ;;  %v340_v21 = vld [vmem:[%s596_s23 + $0x12] ss:$8 sm:$0x3] }
  0x3b   : > { %v180_v22 = vadd.f32 %v179_v8, %v176_v14  ;;  %v195_v23 = vadd.f32 %v194_v16, %v191_v11  ;;  %v210_v24 = vmul.f32 %v339_v20, %v328_v1  ;;  %v214_v25 = vmul.f32 %v340_v21, %v329_v2  ;;  %v336_v26 = vld [vmem:[%s596_s23 + $0x7] ss:$8 sm:$0x3]  ;;  %v341_v30 = vld [vmem:[%s596_s23 + $0x13] ss:$8 sm:$0x3] }
  0x3d   : > { %v183_v27 = vadd.f32 %v332_v15, %v180_v22  ;;  %v199_v28 = vadd.f32 %v198_v17, %v195_v23  ;;  %v211_v29 = vadd.f32 %v210_v24, %v207_v19 }
  0x3f   : > { %188 = vst.msk [vmem:[%s163_s25] ss:$4 sm:$0x3] %vm186_vm0, %v183_v27  ;;  %v202_v31 = vadd.f32 %v336_v26, %v199_v28  ;;  %v215_v32 = vadd.f32 %v214_v25, %v211_v29 }
  0x41   : > { %337 = vst.msk [vmem:[%s163_s25 + $0x1] ss:$4 sm:$0x3] %vm186_vm0, %v202_v31  ;;  %v218_v33 = vadd.f32 %v341_v30, %v215_v32 }
  0x43   : > { %342 = vst.msk [vmem:[%s163_s25 + $0x2] ss:$4 sm:$0x3] %vm186_vm0, %v218_v33 }
  0x44 PF: > { %s14_s11 = sadd.s32 1, %s484_s11   ;;  %s648_s6 = smov %s468_s7 }
  0x45   : > { %p11_p7 = scmp.ge.s32.totalorder %s14_s11, 4   ;;  %s649_s7 = smov %s472_s8 }
  0x46   : > { %s650_s8 = smov %s548_s18  ;;  %s651_s9 = smov %s480_s10 }
  0x47   : > { %s652_s10 = smov %s654_s13  ;;  %13 = sbr.rel (!%p11_p7) target bundleno = 4 (0x4), region = 80 }
  0x4e   :  { %251 = vsyncpa [#allocation3], 1 }
  0x4f   :  { %253 = vsyncpa [#allocation3 + $0x1], 1 }

</bundles_post_ra>
